<compile_context>
chip_gen: v5e
topology: v5e:2x2
jax: 0.10.0
libtpu: 0.0.40
codegen_flags: <defaults>
</compile_context>

<pallas_src>
import functools
import math

import jax
import jax.numpy as jnp
from jax.experimental import pallas as pl
from jax.experimental.pallas import tpu as pltpu


# ---------------------------------------------------------------------------
# Kernels
# ---------------------------------------------------------------------------
def _rmsnorm_kernel(x_ref, w_ref, o_ref, *, eps, x_dtype):
    """Single-pass RMSNorm on a (rows_tile, dim) slab (full-row reduce)."""
    x = x_ref[...].astype(jnp.float32)                   # x.float()
    w = w_ref[...]                                       # already f32 (wrapper cast)

    ms = jnp.mean(x * x, axis=-1, keepdims=True)         # pow(2).mean(-1, keepdim=True)
    inv = jax.lax.rsqrt(ms + eps)                        # rsqrt(... + eps)

    if jnp.dtype(x_dtype) == jnp.dtype(jnp.float32):
        # .type_as(x) is a no-op for f32 — skip the cast round trip.
        o_ref[...] = (x * inv * w).astype(o_ref.dtype)
    else:
        # Exactly one truncation to x's dtype (matches `.type_as(x)`), then the
        # promoted-dtype multiply with the weight.
        normed = (x * inv).astype(x_dtype)
        o_ref[...] = (normed.astype(jnp.float32) * w).astype(o_ref.dtype)


def _ssq_kernel(x_ref, ssq_ref, *, dim, dchunk):
    """Fallback pass 1: per-row sum of squares, accumulated over dim chunks."""
    j = pl.program_id(1)

    @pl.when(j == 0)
    def _():
        ssq_ref[...] = jnp.zeros_like(ssq_ref)

    x = x_ref[...].astype(jnp.float32)
    # Mask ragged lanes of the last dim chunk so garbage can't pollute mean(-1).
    col = j * dchunk + jax.lax.broadcasted_iota(jnp.int32, x.shape, 1)
    x = jnp.where(col < dim, x, 0.0)
    ssq_ref[...] += jnp.sum(x * x, axis=-1, keepdims=True)


def _apply_kernel(ssq_ref, x_ref, w_ref, o_ref, *, eps, dim, x_dtype):
    """Fallback pass 2: normalize a (rows_tile, dim_chunk) block."""
    x = x_ref[...].astype(jnp.float32)
    w = w_ref[...]
    inv = jax.lax.rsqrt(ssq_ref[...] * (1.0 / dim) + eps)
    if jnp.dtype(x_dtype) == jnp.dtype(jnp.float32):
        o_ref[...] = (x * inv * w).astype(o_ref.dtype)
    else:
        normed = (x * inv).astype(x_dtype)
        o_ref[...] = (normed.astype(jnp.float32) * w).astype(o_ref.dtype)


# ---------------------------------------------------------------------------
# Wrapper
# ---------------------------------------------------------------------------
def _round_up(n, m):
    return ((n + m - 1) // m) * m


def _vmem_budgets():
    """(pipelined-buffer budget, vmem_limit_bytes) by TPU generation."""
    cap = None
    try:
        cap = getattr(pltpu.get_tpu_info(), "vmem_capacity_bytes", None)
    except Exception:
        cap = None
    if cap is None:
        cap = 64 * 1024 * 1024            # conservative: assume v7x per-TC VMEM
    if cap >= 96 * 1024 * 1024:           # v5e / v6e: 128 MiB physical VMEM
        return 48 * 1024 * 1024, 80 * 1024 * 1024
    return 20 * 1024 * 1024, 40 * 1024 * 1024   # v7x: 64 MiB per TC


def rmsnorm(x, weight, eps=1e-6, out_dtype=None, max_buffer_bytes=None):
    """RMSNorm forward matching the PyTorch module's semantics.

    x:       (..., dim) array
    weight:  (dim,) learnable scale
    out_dtype: override output dtype (e.g. keep bf16 end-to-end to halve HBM
               writes).  Default = promote(x.dtype, weight.dtype) for strict
               PyTorch parity.
    max_buffer_bytes: override the VMEM buffer budget (mainly for testing the
               large-dim two-pass fallback).
    """
    dim = x.shape[-1]
    lead_shape = x.shape[:-1]
    rows = int(math.prod(lead_shape)) if lead_shape else 1

    if out_dtype is None:
        # torch: (normed.type_as(x)) * weight  -> promoted dtype
        out_dtype = jnp.promote_types(x.dtype, weight.dtype)

    x2d = x.reshape(rows, dim)
    # Cast weight to f32 once here (removes a per-grid-step cast in the kernel).
    w2d = weight.reshape(1, dim).astype(jnp.float32)

    in_b = jnp.dtype(x.dtype).itemsize
    out_b = jnp.dtype(out_dtype).itemsize
    # Sublane packing factor: 8 rows/vreg (4B), 16 (2B), 32 (1B).
    align = max(8, 32 // in_b)

    buf_budget, vmem_limit = _vmem_budgets()
    if max_buffer_bytes is not None:
        buf_budget = max_buffer_bytes

    # Per-row VMEM cost: 2x double-buffered in/out tiles + compiler-managed
    # f32 working set (x.astype(f32), x*inv temporaries) — the latter is
    # ~3 f32 copies for sub-32-bit inputs, ~1 for f32 inputs.
    pipe_row = dim * (in_b + out_b)
    comp_row = dim * 4 * (3 if in_b < 4 else 1)
    cost_row = 2 * pipe_row + comp_row

    tile = (buf_budget // cost_row // align) * align

    if tile >= align:
        # ----------------- single-pass path (full row resident) -------------
        tile = min(tile, _round_up(rows, align))

        # Keep enough grid steps for dual-TC sharding on v7x, but only when
        # the split tiles stay large (>= ~2 MiB) — never over-split small
        # (decode-sized) inputs on single-TC v5e/v6e.
        TARGET_STEPS = 4
        if pl.cdiv(rows, tile) < TARGET_STEPS:
            split = max(align, _round_up(pl.cdiv(rows, TARGET_STEPS), align))
            if split * pipe_row >= (2 << 20):
                tile = min(tile, split)

        grid = (pl.cdiv(rows, tile),)  # ragged last row block is masked
        kernel = functools.partial(_rmsnorm_kernel, eps=eps, x_dtype=x.dtype)

        out2d = pl.pallas_call(
            kernel,
            out_shape=jax.ShapeDtypeStruct((rows, dim), out_dtype),
            grid_spec=pltpu.PrefetchScalarGridSpec(
                num_scalar_prefetch=0,
                grid=grid,
                in_specs=[
                    pl.BlockSpec((tile, dim), lambda i: (i, 0)),   # x row tile
                    pl.BlockSpec((1, dim), lambda i: (0, 0)),      # weight (resident)
                ],
                out_specs=pl.BlockSpec((tile, dim), lambda i: (i, 0)),
            ),
            # TODO(synk): on v7x, verify the row axis actually shards across
            # both TensorCores; if plain "parallel" doesn't split it, switch
            # this axis to pltpu.CORE_PARALLEL.
            compiler_params=pltpu.CompilerParams(
                dimension_semantics=("parallel",),
                vmem_limit_bytes=vmem_limit,
            ),
        )(x2d, w2d)
    else:
        # ----------------- two-pass fallback for very large `dim` -----------
        # Even `align` rows x full dim exceeds the buffer budget, so block the
        # lane axis.  mean(-1) needs the full-row reduce, hence two passes:
        #   pass 1: per-row sum of squares (chunked, masked ragged lanes)
        #   pass 2: normalize + scale (chunked)
        per_elem = 2 * (in_b + out_b) + 4 * (3 if in_b < 4 else 1)
        dchunk = (buf_budget // (align * per_elem) // 128) * 128
        dchunk = max(128, min(dchunk, _round_up(dim, 128)))
        tile = max(align, (buf_budget // (dchunk * per_elem) // align) * align)
        tile = min(tile, _round_up(rows, align))

        grid2 = (pl.cdiv(rows, tile), pl.cdiv(dim, dchunk))

        ssq = pl.pallas_call(
            functools.partial(_ssq_kernel, dim=dim, dchunk=dchunk),
            out_shape=jax.ShapeDtypeStruct((rows, 1), jnp.float32),
            grid_spec=pltpu.PrefetchScalarGridSpec(
                num_scalar_prefetch=0,
                grid=grid2,
                in_specs=[pl.BlockSpec((tile, dchunk), lambda i, j: (i, j))],
                out_specs=pl.BlockSpec((tile, 1), lambda i, j: (i, 0)),
            ),
            compiler_params=pltpu.CompilerParams(
                dimension_semantics=("parallel", "arbitrary"),
                vmem_limit_bytes=vmem_limit,
            ),
        )(x2d)

        out2d = pl.pallas_call(
            functools.partial(_apply_kernel, eps=eps, dim=dim, x_dtype=x.dtype),
            out_shape=jax.ShapeDtypeStruct((rows, dim), out_dtype),
            grid_spec=pltpu.PrefetchScalarGridSpec(
                num_scalar_prefetch=0,
                grid=grid2,
                in_specs=[
                    pl.BlockSpec((tile, 1), lambda i, j: (i, 0)),       # sum of squares
                    pl.BlockSpec((tile, dchunk), lambda i, j: (i, j)),  # x chunk
                    pl.BlockSpec((1, dchunk), lambda i, j: (0, j)),     # weight chunk
                ],
                out_specs=pl.BlockSpec((tile, dchunk), lambda i, j: (i, j)),
            ),
            compiler_params=pltpu.CompilerParams(
                dimension_semantics=("parallel", "arbitrary"),
                vmem_limit_bytes=vmem_limit,
            ),
        )(ssq, x2d, w2d)

    return out2d.reshape(*lead_shape, dim)


# ---------------------------------------------------------------------------
# Reference + tests
# ---------------------------------------------------------------------------
def rmsnorm_ref(x, weight, eps=1e-6):
    xf = x.astype(jnp.float32)
    inv = jax.lax.rsqrt(jnp.mean(xf * xf, axis=-1, keepdims=True) + eps)
    normed = (xf * inv).astype(x.dtype)
    return normed * weight


if __name__ == "__main__":
    eps = 1e-6
    key = jax.random.PRNGKey(0)
    k1, k2, k3, k4, k5 = jax.random.split(key, 5)

    batch, seq, dim = 2, 8, 128

    # 1) f32, divisible row count, torch-style ones weight.
    x = jax.random.normal(k1, (batch, seq, dim), dtype=jnp.float32)
    w = jnp.ones((dim,), dtype=jnp.float32)
    out = jax.block_until_ready(rmsnorm(x, w, eps))
    ref = rmsnorm_ref(x, w, eps)
    assert out.shape == x.shape
    assert jnp.allclose(out, ref, atol=1e-5, rtol=1e-5), "f32 mismatch"

    # 2) bf16 input, non-trivial f32 weight (single-truncation path, promoted out).
    xb = jax.random.normal(k2, (batch, seq, dim), dtype=jnp.float32).astype(jnp.bfloat16)
    wb = 1.0 + 0.1 * jax.random.normal(k3, (dim,), dtype=jnp.float32)
    outb = jax.block_until_ready(rmsnorm(xb, wb, eps))
    refb = rmsnorm_ref(xb, wb, eps)
    assert outb.shape == xb.shape and outb.dtype == refb.dtype
    assert jnp.allclose(outb, refb, atol=1e-2, rtol=1e-2), "bf16 mismatch"

    # 3) Row count not divisible by the tile (ragged row path).
    xr = jax.random.normal(k4, (3, 5, dim), dtype=jnp.float32)
    outr = jax.block_until_ready(rmsnorm(xr, w, eps))
    refr = rmsnorm_ref(xr, w, eps)
    assert outr.shape == xr.shape
    assert jnp.allclose(outr, refr, atol=1e-5, rtol=1e-5), "ragged mismatch"

    # 4) Two-pass large-dim fallback (forced with a tiny buffer budget; also
    #    exercises ragged dim-chunk masking since 512 % 384 != 0).
    xl = jax.random.normal(k5, (16, 512), dtype=jnp.float32)
    wl = 1.0 + 0.05 * jax.random.normal(k3, (512,), dtype=jnp.float32)
    outl = jax.block_until_ready(rmsnorm(xl, wl, eps, max_buffer_bytes=64 * 1024))
    refl = rmsnorm_ref(xl, wl, eps)
    assert outl.shape == xl.shape
    assert jnp.allclose(outl, refl, atol=1e-5, rtol=1e-5), "two-pass mismatch"

    # 5) out_dtype override: keep bf16 end-to-end (halves HBM write traffic).
    outd = jax.block_until_ready(rmsnorm(xb, wb, eps, out_dtype=jnp.bfloat16))
    refd = rmsnorm_ref(xb, wb, eps).astype(jnp.bfloat16)
    assert outd.dtype == jnp.bfloat16 and outd.shape == xb.shape
    assert jnp.allclose(outd.astype(jnp.float32), refd.astype(jnp.float32),
                        atol=2e-2, rtol=2e-2), "out_dtype override mismatch"

    print("KERNEL_OK")
</pallas_src>

<mosaic_0001>
module attributes {stable_mosaic.version = 11 : i64} {
  func.func @_rmsnorm_kernel(%arg0: i32, %arg1: memref<16x128xf32, #tpu.memory_space<vmem>>, %arg2: memref<1x128xf32, #tpu.memory_space<vmem>>, %arg3: memref<16x128xf32, #tpu.memory_space<vmem>>) attributes {dimension_semantics = [#tpu.dimension_semantics<parallel>], iteration_bounds = array<i64: 1>, scalar_prefetch = 0 : i64, scratch_operands = 0 : i64, tpu.core_type = #tpu.core_type<tc>, window_params = [{transform_indices = @transform_0, window_bounds = array<i64: 16, 128>}, {pipeline_mode = #tpu.pipeline_mode<synchronous>, transform_indices = @transform_1, window_bounds = array<i64: 1, 128>}, {transform_indices = @transform_2, window_bounds = array<i64: 16, 128>}]} {
    %c0 = arith.constant 0 : index
    %c0_0 = arith.constant 0 : index
    %0 = vector.load %arg1[%c0, %c0_0] : memref<16x128xf32, #tpu.memory_space<vmem>>, vector<16x128xf32>
    %c0_1 = arith.constant 0 : index
    %c0_2 = arith.constant 0 : index
    %1 = vector.load %arg2[%c0_1, %c0_2] : memref<1x128xf32, #tpu.memory_space<vmem>>, vector<1x128xf32>
    %2 = arith.mulf %0, %0 : vector<16x128xf32>
    %cst = arith.constant dense<0.000000e+00> : vector<16xf32>
    %3 = vector.multi_reduction <add>, %2, %cst [1] : vector<16x128xf32> to vector<16xf32>
    %4 = vector.shape_cast %3 : vector<16xf32> to vector<16x1xf32>
    %cst_3 = arith.constant 1.280000e+02 : f32
    %5 = vector.broadcast %cst_3 : f32 to vector<16x1xf32>
    %6 = arith.divf %4, %5 : vector<16x1xf32>
    %cst_4 = arith.constant 9.99999997E-7 : f32
    %7 = vector.broadcast %cst_4 : f32 to vector<16x1xf32>
    %8 = arith.addf %6, %7 : vector<16x1xf32>
    %9 = math.rsqrt %8 : vector<16x1xf32>
    %10 = vector.broadcast %9 : vector<16x1xf32> to vector<16x128xf32>
    %11 = arith.mulf %0, %10 : vector<16x128xf32>
    %12 = vector.broadcast %1 : vector<1x128xf32> to vector<16x128xf32>
    %13 = arith.mulf %11, %12 : vector<16x128xf32>
    %c0_5 = arith.constant 0 : index
    %c0_6 = arith.constant 0 : index
    %14 = vector.load %arg3[%c0_5, %c0_6] : memref<16x128xf32, #tpu.memory_space<vmem>>, vector<16x128xf32>
    tpu.vector_store %arg3[%c0_5, %c0_6], %13 {strides = array<i32>} : memref<16x128xf32, #tpu.memory_space<vmem>>, vector<16x128xf32>,
    return
  }
  func.func @transform_0(%arg0: i32) -> (i32, i32) {
    %c0_i32 = arith.constant 0 : i32
    %c0_i32_0 = arith.constant 0 : i32
    return %arg0, %c0_i32 : i32, i32
  }
  func.func @transform_1(%arg0: i32) -> (i32, i32) {
    %c0_i32 = arith.constant 0 : i32
    %c0_i32_0 = arith.constant 0 : i32
    %c0_i32_1 = arith.constant 0 : i32
    return %c0_i32, %c0_i32_0 : i32, i32
  }
  func.func @transform_2(%arg0: i32) -> (i32, i32) {
    %c0_i32 = arith.constant 0 : i32
    %c0_i32_0 = arith.constant 0 : i32
    return %arg0, %c0_i32 : i32, i32
  }
}

</mosaic_0001>

<bundles_post_ra>
// kernel: tpu_custom_call.1
= control target key start
LH: loop header
LB: loop body
LE: loop exit
PB: predicated region body
PF: predicated region fallthrough
CT: control target
= control target key end

     0   :  { %7 = vsyncpa [#allocation3], 0  ;;  %s238_s0 = inlined_call_operand.hbm [shape: f32[16,128], index: 0, kind: input, shape index: {}]   ;;  %s239_s1 = inlined_call_operand.hbm [shape: f32[1,128], index: 1, kind: input, shape index: {}]   ;;  %s240_s2 = inlined_call_operand.hbm [shape: f32[16,128], index: 2, kind: output, shape index: {}]  }
   0x1   :  { %8 = vsyncpa [#allocation6], 0 }
   0x2   :  { %9 = vsyncpa [#allocation4], 0  ;;  %s14_s11 = sshll.u32 %s238_s0, 4  ;;  %s202_s12 = smov [#allocation2]   ;;  %s15_s11 = int_to_ptr.hbm [resolvable:$true] %s14_s11 }
   0x3   :  { %s16_s13 = sshll.u32 %s202_s12, 4  ;;  %s28_s16 = sshll.u32 %s239_s1, 4  ;;  %s17_s13 = int_to_ptr.vmem [resolvable:$true] %s16_s13  ;;  %s29_s16 = int_to_ptr.hbm [resolvable:$true] %s28_s16 }
   0x4   :  { %s203_s17 = smov 128   ;;  %s204_s18 = smov 8  }
   0x5   :  { %22 = dma.hbm_to_vmem [thread:$0]  %s15_s11, 256, %s17_s13, [#allocation3], %s203_s17, %s203_s17, %s204_s18  }
   0x6   :  { %s205_s19 = smov [#allocation5]  }
   0x7   :  { %s30_s20 = sshll.u32 %s205_s19, 4  ;;  %s31_s20 = int_to_ptr.vmem [resolvable:$true] %s30_s20 }
   0x8   :  { %33 = dma.hbm_to_vmem [thread:$0]  %s29_s16, 16, %s31_s20, [#allocation6]  }
   0x9   :  { %196 = dma.done.wait [#allocation3], 256  }
   0xa   :  { %197 = vsyncadd [#allocation3], 4294967040 }
   0xb   :  { %198 = dma.done.wait [#allocation6], 16  }
   0xc   :  { %199 = vsyncadd [#allocation6], 4294967280  ;;  %v42_v0 = vld [vmem:[#allocation2] sm:$0xff]  ;;  %v43_v2 = vld [vmem:[#allocation2 + $0x8] sm:$0xff]  ;;  %v206_v4 = vmov 128.0   ;;  %s207_s0 = smov [#allocation7]  }
   0xd   :  { %v45_v1 = vmul.f32 %v42_v0, %v42_v0  ;;  %v46_v3 = vmul.f32 %v43_v2, %v43_v2  ;;  %118 = vrcp.f32 %v206_v4  ;;  %v117_v25 = vld [vmem:[#allocation5] ss:$0 sm:$0xff]  ;;  %s95_s1 = sshll.u32 %s207_s0, 4  ;;  %s97_s23 = sshll.u32 %s240_s2, 4  ;;  %s96_s1 = int_to_ptr.vmem [resolvable:$true] %s95_s1  ;;  %s98_s23 = int_to_ptr.hbm [resolvable:$true] %s97_s23 }
   0xf   :  { %47 = vadd.xlane.f32.xlu0 %v45_v1 }
  0x13   :  { %v119_v5 = vpop.eup %118 }
  0x14   :  { %v52_v6 = vmul.f32 128.0, %v119_v5  ;;  %vm56_vm0 = vweird.f32 %v119_v5 }
  0x16   :  { %v53_v7 = vsub.f32 1.0, %v52_v6 }
  0x17   :  { %49 = vadd.xlane.f32.xlu0 %v46_v3 }
  0x18   :  { %v54_v8 = vmul.f32 %v119_v5, %v53_v7 }
  0x1a   :  { %v55_v9 = vadd.f32 %v119_v5, %v54_v8 }
  0x1c   :  { %v57_v10 = vsel %vm56_vm0, %v119_v5, %v55_v9 }
  0x82   :  { %v48_v11 = vpop.xlane.xlu0 %47 }
  0x83   :  { %v58_v12 = vmul.f32 %v57_v10, %v48_v11 }
  0x85   :  { %v60_v13 = vadd.f32 1e-06, %v58_v12 }
  0x87   :  { %120 = vrsqrt.f32 %v60_v13  ;;  %vm68_vm2 = vweird.f32 %v60_v13 }
  0x8a   :  { %v50_v14 = vpop.xlane.xlu0 %49 }
  0x8b   :  { %v59_v15 = vmul.f32 %v57_v10, %v50_v14 }
  0x8d   :  { %v121_v16 = vpop.eup %120  ;;  %v61_v17 = vadd.f32 1e-06, %v59_v15 }
  0x8e   :  { %v63_v18 = vmul.f32 %v121_v16, %v60_v13  ;;  %vm69_vm1 = vweird.f32 %v121_v16 }
  0x8f   :  { %122 = vrsqrt.f32 %v61_v17  ;;  %vm70_vm3 = vmor %vm68_vm2, %vm69_vm1  ;;  %vm78_vm5 = vweird.f32 %v61_v17 }
  0x90   :  { %v64_v19 = vmul.f32 %v121_v16, %v63_v18 }
  0x92   :  { %v65_v20 = vmul.f32 0.5, %v64_v19 }
  0x94   :  { %v66_v21 = vsub.f32 1.5, %v65_v20 }
  0x95   :  { %v123_v22 = vpop.eup %122 }
  0x96   :  { %v67_v23 = vmul.f32 %v121_v16, %v66_v21  ;;  %v73_v24 = vmul.f32 %v123_v22, %v61_v17  ;;  %vm79_vm4 = vweird.f32 %v123_v22 }
  0x97   :  { %vm80_vm6 = vmor %vm78_vm5, %vm79_vm4 }
  0x98   :  { %v71_v26 = vsel %vm70_vm3, %v121_v16, %v67_v23  ;;  %v74_v27 = vmul.f32 %v123_v22, %v73_v24 }
  0x99   :  { %v82_v28 = vmul.f32 %v71_v26, %v42_v0 }
  0x9a   :  { %v75_v29 = vmul.f32 0.5, %v74_v27 }
  0x9b   :  { %v87_v30 = vmul.f32 %v117_v25, %v82_v28 }
  0x9c   :  { %v76_v31 = vsub.f32 1.5, %v75_v29 }
  0x9d   :  { %89 = vst [vmem:[#allocation7] sm:$0xff] %v87_v30 }
  0x9e   :  { %v77_v32 = vmul.f32 %v123_v22, %v76_v31 }
  0xa0   :  { %v81_v33 = vsel %vm80_vm6, %v123_v22, %v77_v32 }
  0xa1   :  { %v83_v34 = vmul.f32 %v81_v33, %v43_v2 }
  0xa3   :  { %v88_v35 = vmul.f32 %v117_v25, %v83_v34 }
  0xa5   :  { %90 = vst [vmem:[#allocation7 + $0x8] sm:$0xff] %v88_v35 }
  0xa6   :  { %103 = dma.vmem_to_hbm [thread:$0]  %s96_s1, 256, %s98_s23, [#allocation4], %s203_s17, %s203_s17, %s204_s18  }
  0xa7   :  { %200 = dma.done.wait [#allocation4], 256  }
  0xa8   :  { %201 = vsyncadd [#allocation4], 4294967040 }
  0xa9   :  { %108 = vsyncpa [#allocation3], 1 }
  0xaa   :  { %109 = vsyncpa [#allocation6], 1 }
  0xab   :  { %110 = vsyncpa [#allocation4], 1 }

</bundles_post_ra>
